<compile_context>
chip_gen: v5e
topology: v5e:2x2
jax: 0.10.0
libtpu: 0.0.40
codegen_flags: <defaults>
</compile_context>

<pallas_src>
import functools

import jax
import jax.numpy as jnp
from jax import lax
from jax.experimental import pallas as pl
from jax.experimental.pallas import tpu as pltpu


# Off-center depthwise taps, fixed order shared by mask builder and kernel.
_TAPS = tuple((dy, dx) for dy in (-1, 0, 1) for dx in (-1, 0, 1)
              if (dy, dx) != (0, 0))


# ------------------------- hardware introspection -------------------------- #

def _tensorcores_per_chip():
    """2 for v7x-class chips (megacore batch split), else 1 (v5e/v6e)."""
    try:
        kind = jax.devices()[0].device_kind.lower()
    except Exception:
        return 1
    return 2 if "v7" in kind else 1


def _roll_matches_jnp_roll():
    """One-time HW probe of pltpu.roll's sign convention (call OUTSIDE jit).

    Returns True if pltpu.roll(x, s)[i] == x[(i - s) % n] (jnp.roll semantics).
    """
    def probe(x_ref, o_ref):
        o_ref[...] = pltpu.roll(x_ref[...], shift=1, axis=1)

    x = lax.broadcasted_iota(jnp.float32, (8, 128), 1)
    out = pl.pallas_call(
        probe, out_shape=jax.ShapeDtypeStruct((8, 128), jnp.float32))(x)
    return bool(out[0, 0] == 127.0)   # jnp.roll convention: out[0] == x[-1]


# ------------------------------ fused kernel ------------------------------- #

def _inverted_residual_kernel(x_ref, w1t_ref, b1_ref, wdw_ref, b2_ref,
                              w3t_ref, b3_ref, mask_ref, o_ref,
                              *, W, identity, roll_like_jnp):
    """expand(1x1)+BN+ReLU6 -> dw(3x3,s1,p1)+BN+ReLU6 -> proj(1x1)+BN (+res).

    Layout: activations are (C, L) with L = images_per_block * H*W in lanes.
    BN scales are pre-folded into the weights; only (C,1) biases remain.
    1x1 convs run on the MXU; depthwise taps are XLU lane rotations with
    precomputed {0,1} border masks (one vmul per tap).
    """
    L = x_ref.shape[-1]
    x = x_ref[...]                                           # (cin, L) f32

    # ---- stage 1: 1x1 expand conv on the MXU, ReLU6 on the VPU -------------
    h = jnp.dot(w1t_ref[...], x, preferred_element_type=jnp.float32)
    h = jnp.clip(h + b1_ref[...], 0.0, 6.0)                  # (hidden, L)

    # ---- stage 2: depthwise 3x3 (stride 1, zero pad 1) + ReLU6 --------------
    # Center tap needs no shift/mask; it also carries the bias add.
    acc = wdw_ref[4] * h + b2_ref[...]                       # (hidden,1)*(hidden,L)
    for t, (dy, dx) in enumerate(_TAPS):
        delta = dy * W + dx                                  # want tap[p] = h[p+delta]
        shift = (-delta) % L if roll_like_jnp else delta % L
        tap = pltpu.roll(h, shift=shift, axis=1)             # XLU rotate (free slot)
        tap = tap * mask_ref[t:t + 1, :]                     # zero-padding mask
        acc = acc + wdw_ref[(dy + 1) * 3 + (dx + 1)] * tap
    d = jnp.clip(acc, 0.0, 6.0)                              # (hidden, L)

    # ---- stage 3: 1x1 projection on the MXU (+ residual) --------------------
    y = jnp.dot(w3t_ref[...], d, preferred_element_type=jnp.float32)
    y = y + b3_ref[...]                                      # (oup, L)
    if identity:
        y = y + x                                            # requires cin == oup
    o_ref[...] = y.astype(o_ref.dtype)


# ------------------------------ host wrapper ------------------------------- #

def inverted_residual_forward(x_nchw, params, *, identity=True,
                              roll_like_jnp=True):
    """Pallas forward of InvertedResidual (expand_ratio != 1, stride == 1)."""
    n, cin, H, W = x_nchw.shape
    hw = H * W
    hidden = params["w_expand"].shape[1]
    oup = params["w_proj"].shape[1]

    # Grid: one block on single-TC chips; split the batch across TCs on v7x.
    n_tc = _tensorcores_per_chip()
    gb = n_tc if (n_tc > 1 and n % n_tc == 0) else 1
    Lb = (n // gb) * hw                                      # lanes per grid step

    # Channels in sublanes, batch*spatial in lanes (multiple of 128 -> dense
    # unmasked stores).  The tiny transpose runs once in XLA outside the kernel.
    x2 = x_nchw.reshape(n, cin, hw).transpose(1, 0, 2).reshape(cin, n * hw)

    # Fold BN scales into the conv weights; 1x1 weights transposed to (out, in)
    # for the MXU dots; depthwise weights as (9, hidden, 1) sublane columns.
    w1t = (params["w_expand"] * params["scale1"][None, :]).T           # (hidden, cin)
    wdw = (params["w_dw"] * params["scale2"][None, None, :]).reshape(9, hidden, 1)
    w3t = (params["w_proj"] * params["scale3"][None, :]).T             # (oup, hidden)
    b1 = params["bias1"].reshape(hidden, 1)
    b2 = params["bias2"].reshape(hidden, 1)
    b3 = params["bias3"].reshape(oup, 1)

    # Precomputed {0,1} border masks for the 8 off-center taps, periodic per
    # image, tiled to the per-block lane width.
    pos = jnp.arange(hw, dtype=jnp.int32)
    row, col = pos // W, pos % W
    base = []
    for dy, dx in _TAPS:
        m = jnp.ones((hw,), jnp.float32)
        if dy == -1:
            m = m * (row >= 1).astype(jnp.float32)
        if dy == 1:
            m = m * (row <= H - 2).astype(jnp.float32)
        if dx == -1:
            m = m * (col >= 1).astype(jnp.float32)
        if dx == 1:
            m = m * (col <= W - 2).astype(jnp.float32)
        base.append(m)
    mask = jnp.tile(jnp.stack(base), (1, n // gb))                      # (8, Lb)

    kernel = functools.partial(_inverted_residual_kernel, W=W,
                               identity=identity,
                               roll_like_jnp=roll_like_jnp)

    out = pl.pallas_call(
        kernel,
        out_shape=jax.ShapeDtypeStruct((oup, n * hw), jnp.float32),
        grid=(gb,),
        in_specs=[
            pl.BlockSpec((cin, Lb), lambda i: (0, i)),
            pl.BlockSpec((hidden, cin), lambda i: (0, 0)),
            pl.BlockSpec((hidden, 1), lambda i: (0, 0)),
            pl.BlockSpec((9, hidden, 1), lambda i: (0, 0, 0)),
            pl.BlockSpec((hidden, 1), lambda i: (0, 0)),
            pl.BlockSpec((oup, hidden), lambda i: (0, 0)),
            pl.BlockSpec((oup, 1), lambda i: (0, 0)),
            pl.BlockSpec((8, Lb), lambda i: (0, 0)),
        ],
        out_specs=pl.BlockSpec((oup, Lb), lambda i: (0, i)),
        compiler_params=pltpu.CompilerParams(
            dimension_semantics=("parallel",)),
    )(x2, w1t, b1, wdw, b2, w3t, b3, mask)

    return out.reshape(oup, n, hw).transpose(1, 0, 2).reshape(n, oup, H, W)


# ---------------------------- params + reference --------------------------- #

def init_params(key, inp, oup, expand_ratio, eps=1e-5):
    hidden = round(inp * expand_ratio)
    ks = jax.random.split(key, 15)

    def bn_fold(kg, kb, km, kv, c):
        gamma = 1.0 + 0.1 * jax.random.normal(kg, (c,), jnp.float32)
        beta = 0.1 * jax.random.normal(kb, (c,), jnp.float32)
        mean = 0.1 * jax.random.normal(km, (c,), jnp.float32)
        var = jnp.abs(jax.random.normal(kv, (c,), jnp.float32)) + 0.5
        scale = gamma / jnp.sqrt(var + eps)
        bias = beta - mean * scale
        return scale, bias

    s1, b1 = bn_fold(ks[3], ks[4], ks[5], ks[6], hidden)
    s2, b2 = bn_fold(ks[7], ks[8], ks[9], ks[10], hidden)
    s3, b3 = bn_fold(ks[11], ks[12], ks[13], ks[14], oup)

    return dict(
        w_expand=0.1 * jax.random.normal(ks[0], (inp, hidden), jnp.float32),
        w_dw=0.1 * jax.random.normal(ks[1], (3, 3, hidden), jnp.float32),
        w_proj=0.1 * jax.random.normal(ks[2], (hidden, oup), jnp.float32),
        scale1=s1, bias1=b1, scale2=s2, bias2=b2, scale3=s3, bias3=b3,
    )


def reference_forward(x_nchw, params, *, identity=True):
    """Pure-JAX (lax.conv) reference with identical semantics."""
    x = jnp.transpose(x_nchw, (0, 2, 3, 1))
    dn = ("NHWC", "HWIO", "NHWC")
    cin = x.shape[-1]
    hidden = params["w_expand"].shape[1]
    oup = params["w_proj"].shape[1]

    h = lax.conv_general_dilated(x, params["w_expand"].reshape(1, 1, cin, hidden),
                                 (1, 1), "VALID", dimension_numbers=dn)
    h = jnp.clip(h * params["scale1"] + params["bias1"], 0.0, 6.0)

    d = lax.conv_general_dilated(h, params["w_dw"].reshape(3, 3, 1, hidden),
                                 (1, 1), ((1, 1), (1, 1)), dimension_numbers=dn,
                                 feature_group_count=hidden)
    d = jnp.clip(d * params["scale2"] + params["bias2"], 0.0, 6.0)

    y = lax.conv_general_dilated(d, params["w_proj"].reshape(1, 1, hidden, oup),
                                 (1, 1), "VALID", dimension_numbers=dn)
    y = y * params["scale3"] + params["bias3"]
    if identity:
        y = y + x
    return jnp.transpose(y, (0, 3, 1, 2))


# ---------------------------------- main ----------------------------------- #

if __name__ == "__main__":
    inp, oup, stride, expand_ratio = 4, 4, 1, 6
    N, H, W = 2, 16, 16
    identity = (stride == 1 and inp == oup)

    key = jax.random.PRNGKey(0)
    k_x, k_p = jax.random.split(key)
    x = jax.random.normal(k_x, (N, inp, H, W), jnp.float32)   # NCHW like PyTorch
    params = init_params(k_p, inp, oup, expand_ratio)

    # One-time probe of pltpu.roll's sign (run eagerly, outside jit).
    roll_like_jnp = _roll_matches_jnp_roll()

    fwd = jax.jit(functools.partial(inverted_residual_forward,
                                    identity=identity,
                                    roll_like_jnp=roll_like_jnp))
    out = jax.block_until_ready(fwd(x, params))

    ref = jax.block_until_ready(reference_forward(x, params, identity=identity))
    assert out.shape == (N, oup, H, W), out.shape
    max_err = float(jnp.max(jnp.abs(out - ref)))
    assert jnp.allclose(out, ref, atol=1e-4, rtol=1e-4), max_err

    print("KERNEL_OK")
</pallas_src>

<mosaic_0001>
module attributes {stable_mosaic.version = 11 : i64} {
  func.func @probe(%arg0: memref<8x128xf32, #tpu.memory_space<vmem>>, %arg1: memref<8x128xf32, #tpu.memory_space<vmem>>) attributes {dimension_semantics = [], scalar_prefetch = 0 : i64, scratch_operands = 0 : i64, tpu.core_type = #tpu.core_type<tc>} {
    %c0 = arith.constant 0 : index
    %c0_0 = arith.constant 0 : index
    %0 = vector.load %arg0[%c0, %c0_0] : memref<8x128xf32, #tpu.memory_space<vmem>>, vector<8x128xf32>
    %c1_i32 = arith.constant 1 : i32
    %1 = tpu.dynamic_rotate %0 by %c1_i32 dim 1 : vector<8x128xf32>, i32 -> vector<8x128xf32>
    %c0_1 = arith.constant 0 : index
    %c0_2 = arith.constant 0 : index
    %2 = vector.load %arg1[%c0_1, %c0_2] : memref<8x128xf32, #tpu.memory_space<vmem>>, vector<8x128xf32>
    tpu.vector_store %arg1[%c0_1, %c0_2], %1 {strides = array<i32>} : memref<8x128xf32, #tpu.memory_space<vmem>>, vector<8x128xf32>,
    return
  }
}

</mosaic_0001>

<bundles_post_ra>
// kernel: tpu_custom_call.1
= control target key start
LH: loop header
LB: loop body
LE: loop exit
PB: predicated region body
PF: predicated region fallthrough
CT: control target
= control target key end

     0   :  { %6 = vsyncpa [#allocation3], 0  ;;  %s118_s0 = inlined_call_operand.hbm [shape: f32[8,128], index: 0, kind: input, shape index: {}]   ;;  %s119_s1 = inlined_call_operand.hbm [shape: f32[8,128], index: 1, kind: output, shape index: {}]  }
   0x1   :  { %7 = vsyncpa [#allocation4], 0  ;;  %s13_s8 = sshll.u32 %s118_s0, 4  ;;  %s99_s9 = smov [#allocation2]   ;;  %s14_s8 = int_to_ptr.hbm [resolvable:$true] %s13_s8 }
   0x2   :  { %s15_s10 = sshll.u32 %s99_s9, 4  ;;  %s16_s10 = int_to_ptr.vmem [resolvable:$true] %s15_s10 }
   0x3   :  { %18 = dma.hbm_to_vmem [thread:$0]  %s14_s8, 128, %s16_s10, [#allocation3]  }
   0x4   :  { %95 = dma.done.wait [#allocation3], 128  }
   0x5   :  { %96 = vsyncadd [#allocation3], 4294967168  ;;  %v23_v0 = vld [vmem:[#allocation2] sm:$0xff]  ;;  %s100_s11 = smov 1   ;;  %s101_s12 = smov [#allocation5]  }
   0x6   :  { %24 = vrot.lane.b32.xlu0 %v23_v0, %s100_s11  ;;  %s32_s13 = sshll.u32 %s101_s12, 4  ;;  %s34_s16 = sshll.u32 %s119_s1, 4  ;;  %s33_s13 = int_to_ptr.vmem [resolvable:$true] %s32_s13  ;;  %s35_s16 = int_to_ptr.hbm [resolvable:$true] %s34_s16 }
  0x78   :  { %v25_v1 = vpop.permute.xlu0 %24 }
  0x79   :  { %26 = vst [vmem:[#allocation5] sm:$0xff] %v25_v1 }
  0x7a   :  { %37 = dma.vmem_to_hbm [thread:$0]  %s33_s13, 128, %s35_s16, [#allocation4]  }
  0x7b   :  { %97 = dma.done.wait [#allocation4], 128  }
  0x7c   :  { %98 = vsyncadd [#allocation4], 4294967168 }
  0x7d   :  { %42 = vsyncpa [#allocation3], 1 }
  0x7e   :  { %43 = vsyncpa [#allocation4], 1 }

</bundles_post_ra>
